<compile_context>
chip_gen: v5e
topology: v5e:2x2
jax: 0.10.0
libtpu: 0.0.40
codegen_flags: <defaults>
</compile_context>

<pallas_src>
import functools

import jax
import jax.numpy as jnp
from jax.experimental import pallas as pl
from jax.experimental.pallas import tpu as pltpu

ALPHA = 0.25
GAMMA = 2.0  # kernel specializes gamma == 2.0 -> (1 - pt)**2 as a plain square

_LANES = 128


def _focal_loss_kernel(x_ref, oh_ref, out_ref, acc_ref, *, num_valid):
    """Processes one (TILE_R, 128) slab of the flattened (N*C,) element stream.

    x_ref  : (TILE_R, 128) logits (any float dtype; cast to f32 inside)
    oh_ref : (TILE_R, 128) int8 one-hot target map (1 where class == target)
    out_ref: (1, 1) f32 SMEM scalar -- mean focal loss (written on last step)
    acc_ref: (1, 128) f32 VMEM scratch -- running per-lane partial sums
    """
    step = pl.program_id(0)

    @pl.when(step == 0)
    def _init():
        acc_ref[...] = jnp.zeros_like(acc_ref)

    x = x_ref[...].astype(jnp.float32)
    one_hot = oh_ref[...].astype(jnp.int32) > 0

    tile_rows = x_ref.shape[0]
    row = jax.lax.broadcasted_iota(jnp.int32, x.shape, 0) + step * tile_rows
    lane = jax.lax.broadcasted_iota(jnp.int32, x.shape, 1)
    flat_idx = row * _LANES + lane
    # Masks wrapper pad elements and any rows of a partial final grid block.
    valid = flat_idx < num_valid

    # Stable BCE-with-logits vs. the one-hot target using only 2 EUP
    # transcendentals (exp, log1p):
    #   z   = x  if target == 1 else -x
    #   bce = max(-z, 0) + log1p(exp(-|x|))        (== -log(sigmoid(z)))
    #   pt  = exp(-bce) = sigmoid(z)               (reciprocal identity)
    z = jnp.where(one_hot, x, -x)
    e = jnp.exp(-jnp.abs(x))
    bce = jnp.maximum(-z, 0.0) + jnp.log1p(e)
    r = pl.reciprocal(1.0 + e, approx=True)        # EUP vrcp slot, ~free
    pt = jnp.where(z >= 0.0, r, e * r)

    q = 1.0 - pt                                   # gamma == 2.0 -> square
    f_loss = ALPHA * (q * q) * bce
    f_loss = jnp.where(valid, f_loss, 0.0)

    # Sublane (XLU) reduce per tile; lane-wise accumulate across grid steps.
    acc_ref[...] += jnp.sum(f_loss, axis=0, keepdims=True)

    @pl.when(step == pl.num_programs(0) - 1)
    def _finalize():
        out_ref[0, 0] = jnp.sum(acc_ref[...]) * (1.0 / num_valid)


def focal_loss(inputs, targets, *, tile_rows=2048):
    """inputs: (N, C) float logits; targets: (N,) int class indices."""
    n, c = inputs.shape
    num_valid = n * c

    # One-hot "scatter" as a 1-byte/element map, flattened row-major so it
    # lines up exactly with the flattened logits stream.
    one_hot = (
        targets.reshape(n, 1).astype(jnp.int32)
        == jnp.arange(c, dtype=jnp.int32)[None, :]
    ).astype(jnp.int8)

    x_flat = inputs.reshape(num_valid)        # keep caller dtype (bf16 OK)
    oh_flat = one_hot.reshape(num_valid)

    rem = num_valid % _LANES
    if rem:
        pad = _LANES - rem
        x_flat = jnp.pad(x_flat, (0, pad))    # pad elements masked in-kernel
        oh_flat = jnp.pad(oh_flat, (0, pad))
    rows = x_flat.shape[0] // _LANES
    x2 = x_flat.reshape(rows, _LANES)
    oh2 = oh_flat.reshape(rows, _LANES)

    if rows <= tile_rows:
        tr = rows                              # single full-extent block
    else:
        tr = max(32, (tile_rows // 32) * 32)   # keep int8 sublane tiling happy
    grid = (pl.cdiv(rows, tr),)

    kernel = functools.partial(_focal_loss_kernel, num_valid=num_valid)
    out = pl.pallas_call(
        kernel,
        out_shape=jax.ShapeDtypeStruct((1, 1), jnp.float32),
        grid_spec=pltpu.PrefetchScalarGridSpec(
            num_scalar_prefetch=0,
            grid=grid,
            in_specs=[
                pl.BlockSpec((tr, _LANES), lambda i: (i, 0)),
                pl.BlockSpec((tr, _LANES), lambda i: (i, 0)),
            ],
            out_specs=pl.BlockSpec((1, 1), lambda i: (0, 0),
                                   memory_space=pltpu.SMEM),
            scratch_shapes=[pltpu.VMEM((1, _LANES), jnp.float32)],
        ),
        compiler_params=pltpu.CompilerParams(
            dimension_semantics=("arbitrary",)),   # accumulator carried axis
    )(x2, oh2)
    return out[0, 0]


def focal_loss_ref(inputs, targets):
    # Pure-JAX reference mirroring the PyTorch module.
    n, c = inputs.shape
    x = inputs.astype(jnp.float32)
    one_hot = jax.nn.one_hot(targets, c, dtype=jnp.float32)
    bce = jnp.maximum(x, 0.0) - x * one_hot + jnp.log1p(jnp.exp(-jnp.abs(x)))
    pt = jnp.exp(-bce)
    return jnp.mean(ALPHA * (1.0 - pt) ** GAMMA * bce)


if __name__ == "__main__":
    key = jax.random.PRNGKey(0)
    k1, k2, k3, k4 = jax.random.split(key, 4)

    # Small shapes implied by the module forward: (N, C) logits, (N,) class ids.
    N, C = 8, 16
    x = jax.random.normal(k1, (N, C), dtype=jnp.float32)
    t = jax.random.randint(k2, (N,), 0, C, dtype=jnp.int32)
    loss = focal_loss(x, t)
    jax.block_until_ready(loss)
    ref = focal_loss_ref(x, t)
    assert jnp.allclose(loss, ref, atol=1e-3, rtol=1e-3), (loss, ref)

    # Larger case exercising the multi-step grid, the running-sum accumulator
    # and pad-element masking (N*C not a multiple of 128).
    N2, C2 = 4090, 16
    x2 = jax.random.normal(k3, (N2, C2), dtype=jnp.float32)
    t2 = jax.random.randint(k4, (N2,), 0, C2, dtype=jnp.int32)
    loss2 = focal_loss(x2, t2, tile_rows=128)
    jax.block_until_ready(loss2)
    ref2 = focal_loss_ref(x2, t2)
    assert jnp.allclose(loss2, ref2, atol=1e-3, rtol=1e-3), (loss2, ref2)

    print("KERNEL_OK")
</pallas_src>

<mosaic_0001>
module attributes {stable_mosaic.version = 11 : i64} {
  func.func @_focal_loss_kernel(%arg0: i32, %arg1: memref<1x128xf32, #tpu.memory_space<vmem>>, %arg2: memref<1x128xi8, #tpu.memory_space<vmem>>, %arg3: memref<1x1xf32, #tpu.memory_space<smem>>, %arg4: memref<1x128xf32, #tpu.memory_space<vmem>>) attributes {dimension_semantics = [#tpu.dimension_semantics<arbitrary>], iteration_bounds = array<i64: 1>, scalar_prefetch = 0 : i64, scratch_operands = 1 : i64, tpu.core_type = #tpu.core_type<tc>, window_params = [{transform_indices = @transform_0, window_bounds = array<i64: 1, 128>}, {transform_indices = @transform_1, window_bounds = array<i64: 1, 128>}, {transform_indices = @transform_2, window_bounds = array<i64: 1, 1>}]} {
    %c0_i32 = arith.constant 0 : i32
    %0 = arith.cmpi eq, %arg0, %c0_i32 : i32
    %1 = arith.extui %0 : i1 to i32
    %c0_i32_0 = arith.constant 0 : i32
    %2 = arith.cmpi ne, %1, %c0_i32_0 : i32
    scf.if %2 {
      %cst_21 = arith.constant 0.000000e+00 : f32
      %54 = vector.broadcast %cst_21 : f32 to vector<1x128xf32>
      %c0_22 = arith.constant 0 : index
      %c0_23 = arith.constant 0 : index
      %55 = vector.load %arg4[%c0_22, %c0_23] : memref<1x128xf32, #tpu.memory_space<vmem>>, vector<1x128xf32>
      tpu.vector_store %arg4[%c0_22, %c0_23], %54 {strides = array<i32>} : memref<1x128xf32, #tpu.memory_space<vmem>>, vector<1x128xf32>,
    } else {
    }
    %c0 = arith.constant 0 : index
    %c0_1 = arith.constant 0 : index
    %3 = vector.load %arg1[%c0, %c0_1] : memref<1x128xf32, #tpu.memory_space<vmem>>, vector<1x128xf32>
    %c0_2 = arith.constant 0 : index
    %c0_3 = arith.constant 0 : index
    %4 = vector.load %arg2[%c0_2, %c0_3] : memref<1x128xi8, #tpu.memory_space<vmem>>, vector<1x128xi8>
    %5 = arith.extsi %4 : vector<1x128xi8> to vector<1x128xi32>
    %c0_i32_4 = arith.constant 0 : i32
    %6 = vector.broadcast %c0_i32_4 : i32 to vector<1x128xi32>
    %7 = arith.cmpi sgt, %5, %6 : vector<1x128xi32>
    %8 = tpu.iota {dimensions = array<i32: 0>} : vector<1x128xi32>
    %c1_i32 = arith.constant 1 : i32
    %9 = arith.muli %arg0, %c1_i32 : i32
    %10 = vector.broadcast %9 : i32 to vector<1x128xi32>
    %11 = arith.addi %8, %10 : vector<1x128xi32>
    %12 = tpu.iota {dimensions = array<i32: 1>} : vector<1x128xi32>
    %c128_i32 = arith.constant 128 : i32
    %13 = vector.broadcast %c128_i32 : i32 to vector<1x128xi32>
    %14 = arith.muli %11, %13 : vector<1x128xi32>
    %15 = arith.addi %14, %12 : vector<1x128xi32>
    %c128_i32_5 = arith.constant 128 : i32
    %16 = vector.broadcast %c128_i32_5 : i32 to vector<1x128xi32>
    %17 = arith.cmpi slt, %15, %16 : vector<1x128xi32>
    %cst = arith.constant 0.000000e+00 : f32
    %18 = vector.broadcast %cst : f32 to vector<1x128xf32>
    %19 = arith.subf %18, %3 : vector<1x128xf32>
    %20 = arith.select %7, %3, %19 : vector<1x128xi1>, vector<1x128xf32>
    %21 = math.absf %3 : vector<1x128xf32>
    %cst_6 = arith.constant 0.000000e+00 : f32
    %22 = vector.broadcast %cst_6 : f32 to vector<1x128xf32>
    %23 = arith.subf %22, %21 : vector<1x128xf32>
    %24 = math.exp %23 : vector<1x128xf32>
    %cst_7 = arith.constant 0.000000e+00 : f32
    %25 = vector.broadcast %cst_7 : f32 to vector<1x128xf32>
    %26 = arith.subf %25, %20 : vector<1x128xf32>
    %cst_8 = arith.constant 0.000000e+00 : f32
    %27 = vector.broadcast %cst_8 : f32 to vector<1x128xf32>
    %28 = arith.maximumf %26, %27 : vector<1x128xf32>
    %29 = math.log1p %24 : vector<1x128xf32>
    %30 = arith.addf %28, %29 : vector<1x128xf32>
    %cst_9 = arith.constant 1.000000e+00 : f32
    %31 = vector.broadcast %cst_9 : f32 to vector<1x128xf32>
    %32 = arith.addf %31, %24 : vector<1x128xf32>
    %33 = tpu.reciprocal %32 {approx = true} : vector<1x128xf32> -> vector<1x128xf32>
    %cst_10 = arith.constant 0.000000e+00 : f32
    %34 = vector.broadcast %cst_10 : f32 to vector<1x128xf32>
    %35 = arith.cmpf oge, %20, %34 : vector<1x128xf32>
    %36 = arith.mulf %24, %33 : vector<1x128xf32>
    %37 = arith.select %35, %33, %36 : vector<1x128xi1>, vector<1x128xf32>
    %cst_11 = arith.constant 1.000000e+00 : f32
    %38 = vector.broadcast %cst_11 : f32 to vector<1x128xf32>
    %39 = arith.subf %38, %37 : vector<1x128xf32>
    %40 = arith.mulf %39, %39 : vector<1x128xf32>
    %cst_12 = arith.constant 2.500000e-01 : f32
    %41 = vector.broadcast %cst_12 : f32 to vector<1x128xf32>
    %42 = arith.mulf %41, %40 : vector<1x128xf32>
    %43 = arith.mulf %42, %30 : vector<1x128xf32>
    %cst_13 = arith.constant 0.000000e+00 : f32
    %44 = vector.broadcast %cst_13 : f32 to vector<1x128xf32>
    %45 = arith.select %17, %43, %44 : vector<1x128xi1>, vector<1x128xf32>
    %c0_14 = arith.constant 0 : index
    %c0_15 = arith.constant 0 : index
    %46 = vector.load %arg4[%c0_14, %c0_15] : memref<1x128xf32, #tpu.memory_space<vmem>>, vector<1x128xf32>
    %cst_16 = arith.constant dense<0.000000e+00> : vector<128xf32>
    %47 = vector.multi_reduction <add>, %45, %cst_16 [0] : vector<1x128xf32> to vector<128xf32>
    %48 = vector.shape_cast %47 : vector<128xf32> to vector<1x128xf32>
    %49 = arith.addf %46, %48 : vector<1x128xf32>
    %c0_17 = arith.constant 0 : index
    %c0_18 = arith.constant 0 : index
    %50 = vector.load %arg4[%c0_17, %c0_18] : memref<1x128xf32, #tpu.memory_space<vmem>>, vector<1x128xf32>
    tpu.vector_store %arg4[%c0_17, %c0_18], %49 {strides = array<i32>} : memref<1x128xf32, #tpu.memory_space<vmem>>, vector<1x128xf32>,
    %c0_i32_19 = arith.constant 0 : i32
    %51 = arith.cmpi eq, %arg0, %c0_i32_19 : i32
    %52 = arith.extui %51 : i1 to i32
    %c0_i32_20 = arith.constant 0 : i32
    %53 = arith.cmpi ne, %52, %c0_i32_20 : i32
    scf.if %53 {
      %c0_21 = arith.constant 0 : index
      %c0_22 = arith.constant 0 : index
      %54 = vector.load %arg4[%c0_21, %c0_22] : memref<1x128xf32, #tpu.memory_space<vmem>>, vector<1x128xf32>
      %55 = vector.shape_cast %54 : vector<1x128xf32> to vector<1x1x128xf32>
      %cst_23 = arith.constant dense<0.000000e+00> : vector<1xf32>
      %56 = vector.multi_reduction <add>, %55, %cst_23 [1, 2] : vector<1x1x128xf32> to vector<1xf32>
      %57 = vector.shape_cast %56 : vector<1xf32> to vector<1x1x1xf32>
      %58 = vector.extract %57[0, 0, 0] : f32 from vector<1x1x1xf32>
      %cst_24 = arith.constant 7.812500e-03 : f32
      %59 = arith.mulf %58, %cst_24 : f32
      %c0_25 = arith.constant 0 : index
      %c0_26 = arith.constant 0 : index
      %60 = memref.load %arg3[%c0_25, %c0_26] : memref<1x1xf32, #tpu.memory_space<smem>>
      memref.store %59, %arg3[%c0_25, %c0_26] : memref<1x1xf32, #tpu.memory_space<smem>>
    } else {
    }
    return
  }
  func.func @transform_0(%arg0: i32) -> (i32, i32) {
    %c0_i32 = arith.constant 0 : i32
    %c0_i32_0 = arith.constant 0 : i32
    return %arg0, %c0_i32 : i32, i32
  }
  func.func @transform_1(%arg0: i32) -> (i32, i32) {
    %c0_i32 = arith.constant 0 : i32
    %c0_i32_0 = arith.constant 0 : i32
    return %arg0, %c0_i32 : i32, i32
  }
  func.func @transform_2(%arg0: i32) -> (i32, i32) {
    %c0_i32 = arith.constant 0 : i32
    %c0_i32_0 = arith.constant 0 : i32
    %c0_i32_1 = arith.constant 0 : i32
    return %c0_i32, %c0_i32_0 : i32, i32
  }
}

</mosaic_0001>

<bundles_post_ra>
// kernel: tpu_custom_call.1
= control target key start
LH: loop header
LB: loop body
LE: loop exit
PB: predicated region body
PF: predicated region fallthrough
CT: control target
= control target key end

     0   :  { %7 = vsyncpa [#allocation4], 0  ;;  %s231_s0 = inlined_call_operand.hbm [shape: f32[1,128], index: 0, kind: input, shape index: {}]   ;;  %s232_s1 = inlined_call_operand.hbm [shape: s8[1,128], index: 1, kind: input, shape index: {}]   ;;  %s233_s2 = inlined_call_operand.hbm [shape: f32[1,1], index: 2, kind: output, shape index: {}]  }
   0x1   :  { %8 = vsyncpa [#allocation7], 0 }
   0x2   :  { %9 = vsyncpa [#allocation5], 0  ;;  %s15_s11 = sshll.u32 %s231_s0, 4  ;;  %s203_s12 = smov [#allocation3]   ;;  %s16_s11 = int_to_ptr.hbm [resolvable:$true] %s15_s11 }
   0x3   :  { %s17_s13 = sshll.u32 %s203_s12, 4  ;;  %s26_s16 = sshll.u32 %s232_s1, 4  ;;  %s18_s13 = int_to_ptr.vmem [resolvable:$true] %s17_s13  ;;  %s27_s16 = int_to_ptr.hbm [resolvable:$true] %s26_s16 }
   0x4   :  { %20 = dma.hbm_to_vmem [thread:$0]  %s16_s11, 16, %s18_s13, [#allocation4]  }
   0x5   :  { %s204_s17 = smov [#allocation6]  }
   0x6   :  { %s28_s18 = sshll.u32 %s204_s17, 4  ;;  %s29_s18 = int_to_ptr.vmem [resolvable:$true] %s28_s18 }
   0x7   :  { %31 = dma.hbm_to_vmem [thread:$0]  %s27_s16, 16, %s29_s18, [#allocation7]  }
   0x8   :  { %197 = dma.done.wait [#allocation4], 16  }
   0x9   :  { %198 = vsyncadd [#allocation4], 4294967280 }
   0xa   :  { %199 = dma.done.wait [#allocation7], 16  }
   0xb   :  { %200 = vsyncadd [#allocation7], 4294967280  ;;  %v205_v0 = vmov 0.0   ;;  %v45_v1 = vld [vmem:[#allocation3] sm:$0x1]  ;;  %v49_v10 = vlaneseq  ;;  %vm94_vm4 = vcmask 1040384  }
   0xc   :  { %44 = vst [vmem:[#allocation2] sm:$0x1] %v205_v0  ;;  %v60_v2 = vand.u32 2147483647, %v45_v1  ;;  %v46_v5 = vld [vmem:[#allocation6] sm:$0x1] }
   0xd   :  { %v47_v7 = vunpack.c.0.s8 %v46_v5  ;;  %v58_v11 = vsub.f32 0.0, %v45_v1  ;;  %v50_v14 = vshrl.u32 %v49_v10, 7  ;;  %v54_v21 = vand.u32 127, %v49_v10  ;;  %s113_s19 = sshll.u32 %s233_s2, 4  ;;  %s206_s22 = smov [#allocation8]   ;;  %s114_s19 = int_to_ptr.hbm [resolvable:$true] %s113_s19 }
   0xe   :  { %v61_v3 = vsub.f32 0.0, %v60_v2 }
   0xf   :  { %vm48_vm0 = vcmp.gt.s32.totalorder %v47_v7, 0  ;;  %v55_v22 = vmul.u32 128, %v50_v14 }
  0x10   :  { %v62_v4 = vmul.f32 1.442695, %v61_v3  ;;  %v59_v15 = vsel %vm48_vm0, %v45_v1, %v58_v11 }
  0x11   :  { %v64_v16 = vsub.f32 0.0, %v59_v15  ;;  %vm78_vm2 = vcmp.ge.f32.partialorder %v59_v15, 0.0  ;;  %v56_v28 = vadd.s32 %v55_v22, %v54_v21 }
  0x12   :  { %131 = vpow2.f32 %v62_v4 }
  0x13   :  { %v65_v24 = vmax.f32 %v64_v16, 0.0  ;;  %vm57_vm3 = vcmp.lt.s32.totalorder %v56_v28, 128  ;;  %v86_v33 = vld [vmem:[#allocation2] sm:$0x1] }
  0x18   :  { %v132_v6 = vpop.eup %131 }
  0x19   :  { %v66_v8 = vadd.f32 1.0, %v132_v6  ;;  %v69_v9 = vmul.f32 -0.5, %v132_v6  ;;  %v72_v13 = vand.u32 2147483647, %v132_v6 }
  0x1b   :  { %133 = vlog2.f32 %v66_v8  ;;  %v70_v12 = vadd.f32 1.0, %v69_v9  ;;  %vm73_vm1 = vcmp.lt.f32.partialorder %v72_v13, 0.0004427343 }
  0x1c   :  { %135 = vrcp.f32 %v66_v8 }
  0x1d   :  { %v71_v18 = vmul.f32 %v132_v6, %v70_v12 }
  0x21   :  { %v134_v17 = vpop.eup %133 }
  0x22   :  { %v136_v19 = vpop.eup %135  ;;  %v68_v20 = vmul.f32 0.6931472, %v134_v17 }
  0x23   :  { %v79_v23 = vmul.f32 %v136_v19, %v132_v6 }
  0x24   :  { %v74_v25 = vsel %vm73_vm1, %v71_v18, %v68_v20 }
  0x25   :  { %v80_v26 = vsel %vm78_vm2, %v136_v19, %v79_v23  ;;  %v75_v29 = vadd.f32 %v74_v25, %v65_v24 }
  0x26   :  { %v81_v27 = vsub.f32 1.0, %v80_v26 }
  0x28   :  { %v82_v30 = vmul.f32 %v81_v27, %v81_v27 }
  0x2a   :  { %v83_v31 = vmul.f32 0.25, %v82_v30 }
  0x2c   :  { %v84_v32 = vmul.f32 %v83_v31, %v75_v29 }
  0x2e   :  { %v85_v34 = vsel %vm57_vm3, %v84_v32, 0.0 }
  0x2f   :  { %v88_v35 = vadd.f32 %v86_v33, %v85_v34 }
  0x31   :  { %89 = vst [vmem:[#allocation2] sm:$0x1] %v88_v35 }
  0x38   :  { %v93_v36 = vld [vmem:[#allocation2] sm:$0x1] }
  0x39   :  { %v95_v37 = vsel %vm94_vm4, %v93_v36, 0.0 }
  0x3a   :  { %96 = vadd.xlane.f32.xlu0 %v95_v37 }
  0xad   :  { %v97_v38 = vpop.xlane.xlu0 %96 }
  0xae   :  { %v98_v39 = vrot.slane %v97_v38, 4 }
  0xb0   :  { %v99_v40 = vadd.f32 %v98_v39, %v97_v38 }
  0xb2   :  { %v100_v41 = vrot.slane %v99_v40, 2 }
  0xb4   :  { %v101_v42 = vadd.f32 %v100_v41, %v99_v40 }
  0xb6   :  { %v102_v43 = vrot.slane %v101_v42, 1 }
  0xb8   :  { %v103_v44 = vadd.f32 %v102_v43, %v101_v42 }
  0xba   :  { %125 = vpush %v103_v44 }
  0xeb   :  { %s126_s20 = spop %125 }
  0xec   :  { %s105_s21 = smul.f32 0.0078125, %s126_s20 }
  0xee   :  { %107 = sst [smem:[#allocation8]] %s105_s21 }
  0xef   :  { %116 = dma.smem_to_hbm %s206_s22, 16, %s114_s19, [#allocation5]  }
  0xf0   :  { %201 = dma.done.wait [#allocation5], 16  }
  0xf1   :  { %202 = vsyncadd [#allocation5], 4294967280 }
  0xf2   :  { %121 = sfence }
  0xf3   :  { %122 = vsyncpa [#allocation4], 1 }
  0xf4   :  { %123 = vsyncpa [#allocation7], 1 }
  0xf5   :  { %124 = vsyncpa [#allocation5], 1 }

</bundles_post_ra>
